<compile_context>
chip_gen: v5e
topology: v5e:2x2
jax: 0.10.0
libtpu: 0.0.40
codegen_flags: <defaults>
</compile_context>

<pallas_src>
import jax
import jax.numpy as jnp
from jax.experimental import pallas as pl
from jax.experimental.pallas import tpu as pltpu


def _linear1x1_kernel(x_ref, w_ref, b_ref, o_ref):
    # x_ref: (Bt, C_in, tile_s)   w_ref: (C_out, C_in)   b_ref: (C_out, 1) f32
    # o_ref: (Bt, C_out, tile_s)
    w = w_ref[...]
    b = b_ref[...]
    for bi in range(x_ref.shape[0]):          # Bt is a small static block size
        acc = jnp.dot(w, x_ref[bi], preferred_element_type=jnp.float32)  # MXU
        o_ref[bi] = (acc + b).astype(o_ref.dtype)                        # VPU


def _round_up(n, m):
    return -(-n // m) * m


def _vmem_budget_bytes():
    """Working-set budget for blocks + resident weight, from physical VMEM."""
    try:
        cap = pltpu.get_tpu_info().vmem_capacity_bytes  # 128 MiB v5e/v6e, 64 MiB v7x
    except Exception:
        cap = 64 << 20                                   # conservative fallback
    # Stay well inside physical VMEM (headroom for Mosaic internal scratch).
    return int(min(cap // 3, 24 << 20))


def _choose_tiles(B, C_in, C_out, HW, itemsize, budget_bytes, min_programs=2):
    """Pick (Bt, tile_s, footprint) so the VMEM footprint fits the budget and
    at least `min_programs` grid programs exist (v7x has 2 TensorCores)."""
    sub = max(8, 32 // itemsize)           # sublane packing: 8 f32, 16 bf16
    cin_p = _round_up(C_in, sub)
    cout_p = _round_up(C_out, sub)

    # Resident, single-buffered weight (C_out, C_in) + bias (C_out, 1) footprint.
    fixed = (_round_up(C_out, sub) * _round_up(C_in, 128) * itemsize
             + _round_up(C_out, sub) * 128 * 4)

    def blk_bytes(bt, ts):                 # double-buffered x and out blocks
        return 2 * bt * (cin_p + cout_p) * ts * itemsize

    # 1) Largest lane-aligned spatial tile that fits the budget with Bt = 1.
    if HW < 128:
        ts = HW                            # full (short) last dim: always legal
    else:
        ts = min(_round_up(HW, 128), 8192)  # >=512 lanes already ~HBM roofline
        while ts > 128 and fixed + blk_bytes(1, ts) > budget_bytes:
            ts -= 128
    n_s = -(-HW // ts)                     # spatial programs (ragged tail OK)

    # 2) Batch blocking: amortize ~0.35 µs/step while per-step traffic is tiny.
    bt = 1
    while (bt < min(B, 8)
           and fixed + blk_bytes(2 * bt, ts) <= budget_bytes
           and blk_bytes(bt, ts) < (1 << 20)):
        bt *= 2
    bt = min(bt, B)

    # 3) Megacore: guarantee >= min_programs parallel programs when possible.
    if (-(-B // bt)) * n_s < min_programs:
        if B >= min_programs:
            bt = -(-B // min_programs)
        elif HW > 128 and ts > 128:
            ts = max(128, _round_up(-(-_round_up(HW, 128) // min_programs), 128))
            n_s = -(-HW // ts)

    return bt, ts, fixed + blk_bytes(bt, ts)


def linear1x1(x, weight, bias, *, compute_dtype=None):
    """Forward of `linear` (1x1 Conv2d with bias).

    x:      (B, C_in, H, W)
    weight: (C_out, C_in, 1, 1) or (C_out, C_in)
    bias:   (C_out,)
    returns (B, C_out, H, W)
    """
    B, C_in, H, W = x.shape
    C_out = weight.shape[0]
    w2 = weight.reshape(C_out, C_in)
    b2 = bias.reshape(C_out, 1).astype(jnp.float32)   # f32 bias add in-kernel

    if compute_dtype is not None:   # optional bf16 narrowing (HBM-bound win)
        x = x.astype(compute_dtype)
        w2 = w2.astype(compute_dtype)

    HW = H * W
    x_r = x.reshape(B, C_in, HW)    # contiguous reshape, no HBM copy

    itemsize = jnp.dtype(x.dtype).itemsize
    budget = _vmem_budget_bytes()
    Bt, tile_s, footprint = _choose_tiles(B, C_in, C_out, HW, itemsize, budget)
    grid = (pl.cdiv(B, Bt), pl.cdiv(HW, tile_s))

    # Explicit scoped-VMEM limit: footprint + generous headroom, capped at
    # 48 MiB so it stays inside v7x's 64 MiB physical VMEM per TensorCore.
    vmem_limit = int(min(max(footprint * 2 + (4 << 20), 16 << 20), 48 << 20))

    out = pl.pallas_call(
        _linear1x1_kernel,
        out_shape=jax.ShapeDtypeStruct((B, C_out, HW), x.dtype),
        grid=grid,
        in_specs=[
            pl.BlockSpec((Bt, C_in, tile_s), lambda b, s: (b, 0, s)),
            # Constant index_maps: resident in VMEM, single-buffered (no re-DMA).
            pl.BlockSpec((C_out, C_in), lambda b, s: (0, 0),
                         pipeline_mode=pl.Buffered(1)),
            pl.BlockSpec((C_out, 1), lambda b, s: (0, 0),
                         pipeline_mode=pl.Buffered(1)),
        ],
        out_specs=pl.BlockSpec((Bt, C_out, tile_s), lambda b, s: (b, 0, s)),
        compiler_params=pltpu.CompilerParams(
            dimension_semantics=("parallel", "parallel"),
            vmem_limit_bytes=vmem_limit),
    )(x_r, w2, b2)
    return out.reshape(B, C_out, H, W)


def _reference(x, weight, bias):
    """Pure-JAX transcription of Conv2d(kernel_size=1) forward, for checking."""
    w2 = weight.reshape(weight.shape[0], x.shape[1])
    y = jnp.einsum('bchw,oc->bohw', x, w2)
    return y + bias[None, :, None, None]


if __name__ == "__main__":
    key = jax.random.PRNGKey(0)
    k1, k2, k3 = jax.random.split(key, 3)

    # Small shapes consistent with the module: x is (B, c_in, H, W).
    B, C_in, C_out, H, W = 2, 4, 8, 16, 16
    x = jax.random.normal(k1, (B, C_in, H, W), dtype=jnp.float32)
    weight = jax.random.normal(k2, (C_out, C_in, 1, 1), dtype=jnp.float32) * 0.1
    bias = jax.random.normal(k3, (C_out,), dtype=jnp.float32) * 0.1

    fn = jax.jit(linear1x1)
    y = jax.block_until_ready(fn(x, weight, bias))

    ref = _reference(x, weight, bias)
    assert y.shape == (B, C_out, H, W), y.shape
    assert jnp.allclose(y, ref, rtol=1e-5, atol=1e-5), (
        float(jnp.max(jnp.abs(y - ref))))
    print("KERNEL_OK")
</pallas_src>

<mosaic_0001>
module attributes {stable_mosaic.version = 11 : i64} {
  func.func @_linear1x1_kernel(%arg0: i32, %arg1: i32, %arg2: memref<1x4x256xf32, #tpu.memory_space<vmem>>, %arg3: memref<8x4xf32, #tpu.memory_space<vmem>>, %arg4: memref<8x1xf32, #tpu.memory_space<vmem>>, %arg5: memref<1x8x256xf32, #tpu.memory_space<vmem>>) attributes {dimension_semantics = [#tpu.dimension_semantics<parallel>, #tpu.dimension_semantics<parallel>], iteration_bounds = array<i64: 2, 1>, scalar_prefetch = 0 : i64, scratch_operands = 0 : i64, tpu.core_type = #tpu.core_type<tc>, window_params = [{transform_indices = @transform_0, window_bounds = array<i64: 1, 4, 256>}, {pipeline_mode = #tpu.pipeline_mode<synchronous>, transform_indices = @transform_1, window_bounds = array<i64: 8, 4>}, {pipeline_mode = #tpu.pipeline_mode<synchronous>, transform_indices = @transform_2, window_bounds = array<i64: 8, 1>}, {transform_indices = @transform_3, window_bounds = array<i64: 1, 8, 256>}]} {
    %c0 = arith.constant 0 : index
    %c0_0 = arith.constant 0 : index
    %0 = vector.load %arg3[%c0, %c0_0] : memref<8x4xf32, #tpu.memory_space<vmem>>, vector<8x4xf32>
    %c0_1 = arith.constant 0 : index
    %c0_2 = arith.constant 0 : index
    %1 = vector.load %arg4[%c0_1, %c0_2] : memref<8x1xf32, #tpu.memory_space<vmem>>, vector<8x1xf32>
    %c0_3 = arith.constant 0 : index
    %c0_4 = arith.constant 0 : index
    %c0_5 = arith.constant 0 : index
    %2 = vector.load %arg2[%c0_3, %c0_4, %c0_5] : memref<1x4x256xf32, #tpu.memory_space<vmem>>, vector<1x4x256xf32>
    %3 = vector.shape_cast %2 : vector<1x4x256xf32> to vector<4x256xf32>
    %cst = arith.constant dense<0.000000e+00> : vector<8x256xf32>
    %4 = tpu.matmul %0, %3, %cst {dimension_numbers = #tpu.dot_dimension_numbers<[1], [0], [0], [1], [0, 0, 1, 1], [], []>} : vector<8x4xf32>, vector<4x256xf32>, vector<8x256xf32> -> vector<8x256xf32>
    %5 = vector.broadcast %1 : vector<8x1xf32> to vector<8x256xf32>
    %6 = arith.addf %4, %5 : vector<8x256xf32>
    %c0_6 = arith.constant 0 : index
    %c0_7 = arith.constant 0 : index
    %c0_8 = arith.constant 0 : index
    %7 = vector.load %arg5[%c0_6, %c0_7, %c0_8] : memref<1x8x256xf32, #tpu.memory_space<vmem>>, vector<1x8x256xf32>
    %8 = vector.shape_cast %7 : vector<1x8x256xf32> to vector<8x256xf32>
    %9 = vector.shape_cast %6 : vector<8x256xf32> to vector<1x8x256xf32>
    tpu.vector_store %arg5[%c0_6, %c0_7, %c0_8], %9 {strides = array<i32>} : memref<1x8x256xf32, #tpu.memory_space<vmem>>, vector<1x8x256xf32>,
    return
  }
  func.func @transform_0(%arg0: i32, %arg1: i32) -> (i32, i32, i32) {
    %c0_i32 = arith.constant 0 : i32
    %c0_i32_0 = arith.constant 0 : i32
    return %arg0, %c0_i32, %arg1 : i32, i32, i32
  }
  func.func @transform_1(%arg0: i32, %arg1: i32) -> (i32, i32) {
    %c0_i32 = arith.constant 0 : i32
    %c0_i32_0 = arith.constant 0 : i32
    %c0_i32_1 = arith.constant 0 : i32
    return %c0_i32, %c0_i32_0 : i32, i32
  }
  func.func @transform_2(%arg0: i32, %arg1: i32) -> (i32, i32) {
    %c0_i32 = arith.constant 0 : i32
    %c0_i32_0 = arith.constant 0 : i32
    %c0_i32_1 = arith.constant 0 : i32
    return %c0_i32, %c0_i32_0 : i32, i32
  }
  func.func @transform_3(%arg0: i32, %arg1: i32) -> (i32, i32, i32) {
    %c0_i32 = arith.constant 0 : i32
    %c0_i32_0 = arith.constant 0 : i32
    return %arg0, %c0_i32, %arg1 : i32, i32, i32
  }
}

</mosaic_0001>

<bundles_post_ra>
// kernel: linear1x1.1
= control target key start
LH: loop header
LB: loop body
LE: loop exit
PB: predicated region body
PF: predicated region fallthrough
CT: control target
= control target key end

     0   :  { %s448_s12 = smov 0   ;;  %s450_s13 = smov 0   ;;  %s487_s0 = inlined_call_operand.vmem [shape: f32[2,4,256], index: 0, kind: input, shape index: {}]   ;;  %s488_s1 = inlined_call_operand.vmem [shape: f32[8,4], index: 1, kind: input, shape index: {}]   ;;  %s489_s2 = inlined_call_operand.vmem [shape: f32[8,1], index: 2, kind: input, shape index: {}]   ;;  %s490_s3 = inlined_call_operand.vmem [shape: f32[2,8,256], index: 3, kind: output, shape index: {}]  }
   0x1   :  { %s452_s14 = smov 0  }
   0x2 LB: > { %s25_s15 = sadd.s32 1, %s421_s13  ;;  %p364_p0 = scmp.ge.s32.totalorder %s425_s14, 1  ;;  %s425_s14 = sphi %s452_s14, %s13_s14   ;;  %s421_s13 = sphi %s450_s13, %s492_s13   ;;  %s417_s12 = sphi %s448_s12, %s491_s12  }
   0x3   : > { %p27_p1 = scmp.ge.s32.totalorder %s25_s15, 2  ;;  %p158_p2 = scmp.lt.s32.totalorder %s425_s14, 3 }
   0x5   : > { %s494_s15 = smov (%p27_p1, %s25_s15), 0  ;;  %p159_p3 = pnand %p364_p0, %p158_p2 }
   0x6   : > { %p191_p4 = scmp.lt.s32.totalorder (!%p159_p3), %s417_s12, 1 }
   0x7   : > { %162 = sbr.rel (%p159_p3) target bundleno = 155 (0x9b), region = 32 }
   0xc   : > { %v211_v0 = vld [vmem:[%s489_s2] sm:$0xff]  ;;  %v427_v1 = vmov 0   ;;  %s496_s12 = smov (!%p191_p4, %s417_s12), 1  ;;  %vm226_vm0 = vcmask 1043456   ;;  %vm222_vm1 = vcmask 31744  }
   0xd   : > { %402 = vset.pattern.permute.xlu0 %v427_v1  ;;  %s375_s18 = sshll.u32 %s496_s12, 3  ;;  %v210_v3 = vld [vmem:[%s488_s1] sm:$0xff]  ;;  %s376_s24 = sshll.u32 %s496_s12, 4 }
   0xe   : > { %215 = vperm.xlu0 %402, %v211_v0   ;;  %s198_s21 = scalar_lea.vmem %s487_s0, %s375_s18  ;;  %s208_s27 = scalar_lea.vmem %s490_s3, %s376_s24 }
   0xf   : > { %v212_v2 = vld [vmem:[%s198_s21] sm:$0xff] }
  0x10   : > { %219 = vst [vmem:[#allocation1] ss:$2 sm:$0xff] %v212_v2 }
  0x17   : > { %v220_v4 = vld.sshfl [vmem:[#allocation1] sm:$0xff pattern:$0x75316420]  ;;  %v221_v5 = vld.sshfl [vmem:[#allocation1 + $0x8] sm:$0xff pattern:$0x75316420] }
  0x18   : > { %369 = vmatpush.msk.msra.mxu0 %vm226_vm0, %v220_v4  ;;  %371 = vmatpush.msk.msra.mxu1 %vm226_vm0, %v221_v5 }
  0x19   : > { %370 = vmatmul.msk.f32.vlgmr.msra.gmra.mxu0 %vm222_vm1, %v210_v3  ;;  %372 = vmatmul.msk.f32.vlgmr.msra.gmra.mxu1 %vm222_vm1, %v210_v3 }
  0x80   : > { %v216_v6 = vpop.permute.xlu0 %215 }
  0x96   : > { %v248_v7 = vpop.f32.mrf.mxu0  ;;  %v268_v8 = vpop.f32.mrf.mxu1 }
  0x97   : > { %v249_v9 = vadd.f32 %v248_v7, %v216_v6  ;;  %v269_v10 = vadd.f32 %v268_v8, %v216_v6 }
  0x99   : > { %271 = vst [vmem:[%s208_s27] sm:$0xff] %v249_v9 }
  0x9a   : > { %272 = vst [vmem:[%s208_s27 + $0x8] sm:$0xff] %v269_v10 }
  0x9b PF: > { %s13_s14 = sadd.s32 1, %s425_s14   ;;  %s491_s12 = smov %s421_s13 }
  0x9c   : > { %p10_p5 = scmp.ge.s32.totalorder %s13_s14, 4   ;;  %s492_s13 = smov %s494_s15 }
  0x9e   :  { %12 = sbr.rel (!%p10_p5) target bundleno = 2 (0x2), region = 62 }

</bundles_post_ra>
